<compile_context>
chip_gen: v7x
topology: tpu7x:2x2x1
jax: 0.10.0
libtpu: 0.0.40
codegen_flags: <defaults>
</compile_context>

<pallas_src>
import jax
import jax.numpy as jnp
from jax import lax
from jax.experimental import pallas as pl
from jax.experimental.pallas import tpu as pltpu


# ---------------------------------------------------------------------------
# Kernel A: single fused pass -> Gram accumulators (no feature materialization)
# ---------------------------------------------------------------------------
def _feature_gram_kernel(x_ref, w1_ref, b1_ref, y_ref,
                         ftf_ref, ytf_ref, ysq_ref):
    @pl.when(pl.program_id(1) == 0)
    def _():
        ftf_ref[...] = jnp.zeros_like(ftf_ref)
        ytf_ref[...] = jnp.zeros_like(ytf_ref)
        ysq_ref[...] = jnp.zeros_like(ysq_ref)

    # features = tanh(x @ w1 + b1): bf16 MXU matmul, f32 accumulate, f32 tanh.
    z = jnp.dot(x_ref[...], w1_ref[...], preferred_element_type=jnp.float32)
    f32 = jnp.tanh(z + b1_ref[...])
    f = f32.astype(jnp.bfloat16)              # bf16 operands for the Gram matmuls

    y = y_ref[...]                            # f32 targets tile

    # features.T @ features and targets.T @ features as batch-axis contractions
    # (bf16 x bf16 -> f32 accumulation on the MXU, no explicit transposes).
    ftf_ref[...] += lax.dot_general(
        f, f, (((0,), (0,)), ((), ())), preferred_element_type=jnp.float32)
    ytf_ref[...] += lax.dot_general(
        y.astype(jnp.bfloat16), f, (((0,), (0,)), ((), ())),
        preferred_element_type=jnp.float32)
    # Exact f32 per-column sum(Y^2) partials: lets the loss be computed from
    # the Gram identity without a second pass over the batch.
    ysq_ref[...] += jnp.sum(y * y, axis=0, keepdims=True)


# ---------------------------------------------------------------------------
# Kernel B (optional): predictions, recomputing features from x.
# Output is the transposed (out_dim, batch) slab -> lane-dense stores.
# ---------------------------------------------------------------------------
def _predict_kernel(x_ref, w1_ref, b1_ref, u_ref, predt_ref):
    z = jnp.dot(x_ref[...], w1_ref[...], preferred_element_type=jnp.float32)
    f = jnp.tanh(z + b1_ref[...]).astype(jnp.bfloat16)
    # predictions^T = u @ features^T  -> (out_dim, tb); contract the width axis
    # of both operands (bf16 MXU, f32 result).
    predt_ref[...] = lax.dot_general(
        u_ref[...], f, (((1,), (1,)), ((), ())),
        preferred_element_type=jnp.float32)


# ---------------------------------------------------------------------------
# VMEM-budget-aware tile pickers
# ---------------------------------------------------------------------------
_VMEM_BUDGET = 8 * 1024 * 1024   # conservative: fits the 16/32/32 MiB scoped
                                 # defaults of v5e / v6e / v7x with headroom.


def _gram_tile_footprint(tb, in_dim, out_dim, width):
    streamed = 2 * (tb * in_dim * 2 + tb * out_dim * 4)     # x(bf16), y(f32), 2x buffered
    weights = 2 * (in_dim * width * 2 + width * 4)          # w1(bf16), b1(f32)
    resident = (width * width + out_dim * width + out_dim) * 4
    interm = tb * width * (4 + 2)                           # f32 activations + bf16 copy
    return streamed + weights + resident + interm


def _pick_gram_tile(batch, in_dim, out_dim, width, *, max_tile=2048):
    t = max_tile
    while t >= 8:
        if batch % t == 0 and _gram_tile_footprint(t, in_dim, out_dim, width) <= _VMEM_BUDGET:
            return t
        t //= 2
    return batch  # single full-batch block (block_shape == full dim is legal)


def _pick_pred_tile(batch, in_dim, out_dim, width, *, max_tile=2048):
    # The transposed prediction output puts the batch tile on the lane axis,
    # so the tile must be a multiple of 128 (or the full batch).
    t = max_tile
    while t >= 128:
        if batch % t == 0:
            fp = (2 * (t * in_dim * 2 + out_dim * t * 4)
                  + in_dim * width * 2 + width * 4 + out_dim * width * 2
                  + t * width * (4 + 2))
            if fp <= _VMEM_BUDGET:
                return t
        t //= 2
    return batch


# ---------------------------------------------------------------------------
# Wrapper
# ---------------------------------------------------------------------------
def varpro_criterion_unbiased(inputs, targets, w1, b1, lmbda, *,
                              batch_tile=None, num_splits=None,
                              return_predictions=True):
    """Forward pass of VarProCriterionUnbiased.

    Returns (loss, outer_weight, predictions); outer_weight mirrors the
    PyTorch side effect `model.outer.weight = u`.  If `return_predictions` is
    False the second (predictions) kernel is skipped entirely and None is
    returned in its place — the loss only needs a single pass over the batch.
    """
    if not (jnp.issubdtype(inputs.dtype, jnp.floating)
            and jnp.issubdtype(targets.dtype, jnp.floating)):
        raise TypeError("varpro_criterion_unbiased expects floating-point data")

    x = inputs.astype(jnp.float32)
    y = targets.astype(jnp.float32)
    w1 = w1.astype(jnp.float32)
    b1 = b1.astype(jnp.float32)

    batch, in_dim = x.shape
    out_dim = y.shape[1]
    width = w1.shape[1]

    # bf16 copies of the matmul operands (halves the dominant HBM reads; the
    # targets stay f32 so sum(Y^2) is exact, they are cast per-tile in-kernel).
    x_bf = x.astype(jnp.bfloat16)
    w1_bf = w1.astype(jnp.bfloat16)
    b1_2d = b1.reshape(1, width)

    tb = _pick_gram_tile(batch, in_dim, out_dim, width) if batch_tile is None else batch_tile
    if batch % tb != 0:
        raise ValueError(f"batch ({batch}) must be divisible by batch_tile ({tb})")
    nblocks = batch // tb

    if num_splits is None:
        # Two-way "parallel" split feeds both TensorCores on v7x; on 1-TC chips
        # the only cost is summing two small partial accumulators in XLA.
        num_splits = 2 if (nblocks >= 2 and nblocks % 2 == 0) else 1
    if nblocks % num_splits != 0:
        raise ValueError(f"num batch blocks ({nblocks}) must be divisible by "
                         f"num_splits ({num_splits})")
    steps = nblocks // num_splits
    grid = (num_splits, steps)

    # ---- Pallas pass 1: fused feature model + Gram/Y^2 accumulators --------
    cost_a = pl.CostEstimate(
        flops=2 * batch * width * (in_dim + width + out_dim) + 3 * batch * out_dim,
        transcendentals=batch * width,
        bytes_accessed=(2 * batch * in_dim + 2 * in_dim * width + 4 * width
                        + 4 * batch * out_dim
                        + 4 * num_splits * (width * width + out_dim * width + out_dim)),
    )
    ftf_p, ytf_p, ysq_p = pl.pallas_call(
        _feature_gram_kernel,
        out_shape=(
            jax.ShapeDtypeStruct((num_splits, width, width), jnp.float32),
            jax.ShapeDtypeStruct((num_splits, out_dim, width), jnp.float32),
            jax.ShapeDtypeStruct((num_splits, 1, out_dim), jnp.float32),
        ),
        grid_spec=pltpu.PrefetchScalarGridSpec(
            num_scalar_prefetch=0,
            grid=grid,
            in_specs=[
                pl.BlockSpec((tb, in_dim), lambda c, i: (c * steps + i, 0)),
                pl.BlockSpec((in_dim, width), lambda c, i: (0, 0)),
                pl.BlockSpec((1, width), lambda c, i: (0, 0)),
                pl.BlockSpec((tb, out_dim), lambda c, i: (c * steps + i, 0)),
            ],
            out_specs=[
                pl.BlockSpec((None, width, width), lambda c, i: (c, 0, 0)),
                pl.BlockSpec((None, out_dim, width), lambda c, i: (c, 0, 0)),
                pl.BlockSpec((None, 1, out_dim), lambda c, i: (c, 0, 0)),
            ],
        ),
        compiler_params=pltpu.CompilerParams(
            # axis 0: independent per-split accumulators (megacore-shardable),
            # axis 1: the batch reduction that accumulates into ftf/ytf/ysq.
            dimension_semantics=("parallel", "arbitrary"),
        ),
        cost_estimate=cost_a,
    )(x_bf, w1_bf, b1_2d, y)

    # Tiny epilogue reduction over the per-split partials.
    ftf = jnp.sum(ftf_p, axis=0)                # (W, W)  = F^T F
    ytf = jnp.sum(ytf_p, axis=0)                # (O, W)  = Y^T F
    ysq = jnp.sum(ysq_p)                        # scalar  = sum(Y^2)

    # ---- Exact unbiased ridge projection (sets the outer weight u) ---------
    K = ftf / (batch * width)
    A = K + lmbda * jnp.eye(width, dtype=jnp.float32)
    rhs = ytf / batch + lmbda
    # torch.linalg.solve(A, rhs, left=False) solves  u @ A = rhs.
    # TODO(synk): dense LU ridge solve has no clean Pallas equivalent; kept in XLA.
    u = jnp.linalg.solve(A.T, rhs.T).T          # (O, W)

    # ---- Loss directly from the Gram matrices (no second pass needed) ------
    #   SSE = sum((F u^T - Y)^2) = tr(u ftf u^T) - 2 tr(ytf u^T) + sum(Y^2)
    sse = jnp.sum((u @ ftf) * u) - 2.0 * jnp.sum(ytf * u) + ysq
    mse = sse / (batch * out_dim)
    loss = 0.5 * mse / lmbda + 0.5 * jnp.mean((u - 1.0) ** 2)

    preds = None
    if return_predictions:
        # ---- Pallas pass 2 (optional): predictions, features recomputed ----
        tpb = _pick_pred_tile(batch, in_dim, out_dim, width)
        cost_b = pl.CostEstimate(
            flops=2 * batch * width * (in_dim + out_dim),
            transcendentals=batch * width,
            bytes_accessed=(2 * batch * in_dim + 2 * in_dim * width + 4 * width
                            + 2 * out_dim * width + 4 * batch * out_dim),
        )
        preds_t = pl.pallas_call(
            _predict_kernel,
            out_shape=jax.ShapeDtypeStruct((out_dim, batch), jnp.float32),
            grid_spec=pltpu.PrefetchScalarGridSpec(
                num_scalar_prefetch=0,
                grid=(batch // tpb,),
                in_specs=[
                    pl.BlockSpec((tpb, in_dim), lambda i: (i, 0)),
                    pl.BlockSpec((in_dim, width), lambda i: (0, 0)),
                    pl.BlockSpec((1, width), lambda i: (0, 0)),
                    pl.BlockSpec((out_dim, width), lambda i: (0, 0)),
                ],
                out_specs=pl.BlockSpec((out_dim, tpb), lambda i: (0, i)),
            ),
            compiler_params=pltpu.CompilerParams(
                dimension_semantics=("parallel",),
            ),
            cost_estimate=cost_b,
        )(x_bf, w1_bf, b1_2d, u.astype(jnp.bfloat16))
        preds = preds_t.T                        # back to (batch, out_dim)

    return loss, u, preds


if __name__ == "__main__":
    key = jax.random.PRNGKey(0)
    k_in, k_tg, k_w, k_b = jax.random.split(key, 4)

    batch, in_dim, width, out_dim = 128, 32, 128, 8
    lmbda = 0.1

    inputs = jax.random.normal(k_in, (batch, in_dim), dtype=jnp.float32)
    targets = jax.random.normal(k_tg, (batch, out_dim), dtype=jnp.float32)
    w1 = jax.random.normal(k_w, (in_dim, width), dtype=jnp.float32) / jnp.sqrt(in_dim)
    b1 = 0.1 * jax.random.normal(k_b, (width,), dtype=jnp.float32)

    # batch_tile=32 exercises the multi-step accumulation AND the 2-way
    # per-split accumulator path (grid = (2, 2)); the default picker chooses
    # larger tiles for production-sized batches.
    loss, u, preds = varpro_criterion_unbiased(
        inputs, targets, w1, b1, lmbda, batch_tile=32)
    loss, u, preds = jax.block_until_ready((loss, u, preds))

    # Pure-JAX f32 reference mirroring the PyTorch module exactly.
    feats_r = jnp.tanh(inputs @ w1 + b1)
    K_r = feats_r.T @ feats_r / (batch * width)
    A_r = K_r + lmbda * jnp.eye(width, dtype=jnp.float32)
    rhs_r = targets.T @ feats_r / batch + lmbda
    u_r = jnp.linalg.solve(A_r.T, rhs_r.T).T            # solves u @ A = rhs
    preds_r = feats_r @ u_r.T
    loss_r = (0.5 * jnp.mean((preds_r - targets) ** 2) / lmbda
              + 0.5 * jnp.mean((u_r - 1.0) ** 2))

    assert u.shape == (out_dim, width) and preds.shape == (batch, out_dim)
    # Tolerances cover bf16 MXU operands (f32 accumulation) vs the f32 XLA
    # reference; real bugs show up as O(1) relative errors.
    assert jnp.allclose(u, u_r, rtol=5e-2, atol=5e-2)
    assert abs(float(loss) - float(loss_r)) <= 5e-2 * abs(float(loss_r)) + 5e-2
    pred_scale = float(jnp.max(jnp.abs(preds_r)))
    assert float(jnp.max(jnp.abs(preds - preds_r))) <= 5e-2 * pred_scale + 5e-2
    print("KERNEL_OK")
</pallas_src>

<mosaic_0001>
module attributes {stable_mosaic.version = 11 : i64} {
  func.func @_feature_gram_kernel(%arg0: i32, %arg1: i32, %arg2: memref<32x32xbf16, #tpu.memory_space<vmem>>, %arg3: memref<32x128xbf16, #tpu.memory_space<vmem>>, %arg4: memref<1x128xf32, #tpu.memory_space<vmem>>, %arg5: memref<32x8xf32, #tpu.memory_space<vmem>>, %arg6: memref<1x128x128xf32, #tpu.memory_space<vmem>>, %arg7: memref<1x8x128xf32, #tpu.memory_space<vmem>>, %arg8: memref<1x1x8xf32, #tpu.memory_space<vmem>>) attributes {dimension_semantics = [#tpu.dimension_semantics<parallel>, #tpu.dimension_semantics<arbitrary>], iteration_bounds = array<i64: 2, 2>, scalar_prefetch = 0 : i64, scratch_operands = 0 : i64, tpu.core_type = #tpu.core_type<tc>, window_params = [{transform_indices = @transform_0, window_bounds = array<i64: 32, 32>}, {pipeline_mode = #tpu.pipeline_mode<synchronous>, transform_indices = @transform_1, window_bounds = array<i64: 32, 128>}, {pipeline_mode = #tpu.pipeline_mode<synchronous>, transform_indices = @transform_2, window_bounds = array<i64: 1, 128>}, {transform_indices = @transform_3, window_bounds = array<i64: 32, 8>}, {transform_indices = @transform_4, window_bounds = array<i64: 1, 128, 128>}, {transform_indices = @transform_5, window_bounds = array<i64: 1, 8, 128>}, {transform_indices = @transform_6, window_bounds = array<i64: 1, 1, 8>}]} {
    %c0_i32 = arith.constant 0 : i32
    %0 = arith.cmpi eq, %arg1, %c0_i32 : i32
    %1 = arith.extui %0 : i1 to i32
    %c0_i32_0 = arith.constant 0 : i32
    %2 = arith.cmpi ne, %1, %c0_i32_0 : i32
    scf.if %2 {
      %cst_29 = arith.constant 0.000000e+00 : f32
      %36 = vector.broadcast %cst_29 : f32 to vector<128x128xf32>
      %c0_30 = arith.constant 0 : index
      %c0_31 = arith.constant 0 : index
      %c0_32 = arith.constant 0 : index
      %37 = vector.load %arg6[%c0_30, %c0_31, %c0_32] : memref<1x128x128xf32, #tpu.memory_space<vmem>>, vector<1x128x128xf32>
      %38 = vector.shape_cast %37 : vector<1x128x128xf32> to vector<128x128xf32>
      %39 = vector.shape_cast %36 : vector<128x128xf32> to vector<1x128x128xf32>
      tpu.vector_store %arg6[%c0_30, %c0_31, %c0_32], %39 {strides = array<i32>} : memref<1x128x128xf32, #tpu.memory_space<vmem>>, vector<1x128x128xf32>,
      %cst_33 = arith.constant 0.000000e+00 : f32
      %40 = vector.broadcast %cst_33 : f32 to vector<8x128xf32>
      %c0_34 = arith.constant 0 : index
      %c0_35 = arith.constant 0 : index
      %c0_36 = arith.constant 0 : index
      %41 = vector.load %arg7[%c0_34, %c0_35, %c0_36] : memref<1x8x128xf32, #tpu.memory_space<vmem>>, vector<1x8x128xf32>
      %42 = vector.shape_cast %41 : vector<1x8x128xf32> to vector<8x128xf32>
      %43 = vector.shape_cast %40 : vector<8x128xf32> to vector<1x8x128xf32>
      tpu.vector_store %arg7[%c0_34, %c0_35, %c0_36], %43 {strides = array<i32>} : memref<1x8x128xf32, #tpu.memory_space<vmem>>, vector<1x8x128xf32>,
      %cst_37 = arith.constant 0.000000e+00 : f32
      %44 = vector.broadcast %cst_37 : f32 to vector<1x8xf32>
      %c0_38 = arith.constant 0 : index
      %c0_39 = arith.constant 0 : index
      %c0_40 = arith.constant 0 : index
      %45 = vector.load %arg8[%c0_38, %c0_39, %c0_40] : memref<1x1x8xf32, #tpu.memory_space<vmem>>, vector<1x1x8xf32>
      %46 = vector.shape_cast %45 : vector<1x1x8xf32> to vector<1x8xf32>
      %47 = vector.shape_cast %44 : vector<1x8xf32> to vector<1x1x8xf32>
      tpu.vector_store %arg8[%c0_38, %c0_39, %c0_40], %47 {strides = array<i32>} : memref<1x1x8xf32, #tpu.memory_space<vmem>>, vector<1x1x8xf32>,
    } else {
    }
    %c0 = arith.constant 0 : index
    %c0_1 = arith.constant 0 : index
    %3 = vector.load %arg2[%c0, %c0_1] : memref<32x32xbf16, #tpu.memory_space<vmem>>, vector<32x32xbf16>
    %c0_2 = arith.constant 0 : index
    %c0_3 = arith.constant 0 : index
    %4 = vector.load %arg3[%c0_2, %c0_3] : memref<32x128xbf16, #tpu.memory_space<vmem>>, vector<32x128xbf16>
    %cst = arith.constant dense<0.000000e+00> : vector<32x128xf32>
    %5 = tpu.matmul %3, %4, %cst {dimension_numbers = #tpu.dot_dimension_numbers<[1], [0], [0], [1], [0, 0, 1, 1], [], []>} : vector<32x32xbf16>, vector<32x128xbf16>, vector<32x128xf32> -> vector<32x128xf32>
    %c0_4 = arith.constant 0 : index
    %c0_5 = arith.constant 0 : index
    %6 = vector.load %arg4[%c0_4, %c0_5] : memref<1x128xf32, #tpu.memory_space<vmem>>, vector<1x128xf32>
    %7 = vector.broadcast %6 : vector<1x128xf32> to vector<32x128xf32>
    %8 = arith.addf %5, %7 : vector<32x128xf32>
    %9 = math.tanh %8 : vector<32x128xf32>
    %10 = arith.truncf %9 : vector<32x128xf32> to vector<32x128xbf16>
    %c0_6 = arith.constant 0 : index
    %c0_7 = arith.constant 0 : index
    %11 = vector.load %arg5[%c0_6, %c0_7] : memref<32x8xf32, #tpu.memory_space<vmem>>, vector<32x8xf32>
    %c0_8 = arith.constant 0 : index
    %c0_9 = arith.constant 0 : index
    %c0_10 = arith.constant 0 : index
    %12 = vector.load %arg6[%c0_8, %c0_9, %c0_10] : memref<1x128x128xf32, #tpu.memory_space<vmem>>, vector<1x128x128xf32>
    %13 = vector.shape_cast %12 : vector<1x128x128xf32> to vector<128x128xf32>
    %cst_11 = arith.constant dense<0.000000e+00> : vector<128x128xf32>
    %14 = tpu.matmul %10, %10, %cst_11 {dimension_numbers = #tpu.dot_dimension_numbers<[0], [0], [1], [1], [0, 1, 1, 1], [], []>} : vector<32x128xbf16>, vector<32x128xbf16>, vector<128x128xf32> -> vector<128x128xf32>
    %15 = arith.addf %13, %14 : vector<128x128xf32>
    %c0_12 = arith.constant 0 : index
    %c0_13 = arith.constant 0 : index
    %c0_14 = arith.constant 0 : index
    %16 = vector.load %arg6[%c0_12, %c0_13, %c0_14] : memref<1x128x128xf32, #tpu.memory_space<vmem>>, vector<1x128x128xf32>
    %17 = vector.shape_cast %16 : vector<1x128x128xf32> to vector<128x128xf32>
    %18 = vector.shape_cast %15 : vector<128x128xf32> to vector<1x128x128xf32>
    tpu.vector_store %arg6[%c0_12, %c0_13, %c0_14], %18 {strides = array<i32>} : memref<1x128x128xf32, #tpu.memory_space<vmem>>, vector<1x128x128xf32>,
    %c0_15 = arith.constant 0 : index
    %c0_16 = arith.constant 0 : index
    %c0_17 = arith.constant 0 : index
    %19 = vector.load %arg7[%c0_15, %c0_16, %c0_17] : memref<1x8x128xf32, #tpu.memory_space<vmem>>, vector<1x8x128xf32>
    %20 = vector.shape_cast %19 : vector<1x8x128xf32> to vector<8x128xf32>
    %21 = arith.truncf %11 : vector<32x8xf32> to vector<32x8xbf16>
    %cst_18 = arith.constant dense<0.000000e+00> : vector<8x128xf32>
    %22 = tpu.matmul %21, %10, %cst_18 {dimension_numbers = #tpu.dot_dimension_numbers<[0], [0], [1], [1], [0, 1, 1, 1], [], []>} : vector<32x8xbf16>, vector<32x128xbf16>, vector<8x128xf32> -> vector<8x128xf32>
    %23 = arith.addf %20, %22 : vector<8x128xf32>
    %c0_19 = arith.constant 0 : index
    %c0_20 = arith.constant 0 : index
    %c0_21 = arith.constant 0 : index
    %24 = vector.load %arg7[%c0_19, %c0_20, %c0_21] : memref<1x8x128xf32, #tpu.memory_space<vmem>>, vector<1x8x128xf32>
    %25 = vector.shape_cast %24 : vector<1x8x128xf32> to vector<8x128xf32>
    %26 = vector.shape_cast %23 : vector<8x128xf32> to vector<1x8x128xf32>
    tpu.vector_store %arg7[%c0_19, %c0_20, %c0_21], %26 {strides = array<i32>} : memref<1x8x128xf32, #tpu.memory_space<vmem>>, vector<1x8x128xf32>,
    %c0_22 = arith.constant 0 : index
    %c0_23 = arith.constant 0 : index
    %c0_24 = arith.constant 0 : index
    %27 = vector.load %arg8[%c0_22, %c0_23, %c0_24] : memref<1x1x8xf32, #tpu.memory_space<vmem>>, vector<1x1x8xf32>
    %28 = vector.shape_cast %27 : vector<1x1x8xf32> to vector<1x8xf32>
    %29 = arith.mulf %11, %11 : vector<32x8xf32>
    %cst_25 = arith.constant dense<0.000000e+00> : vector<8xf32>
    %30 = vector.multi_reduction <add>, %29, %cst_25 [0] : vector<32x8xf32> to vector<8xf32>
    %31 = vector.shape_cast %30 : vector<8xf32> to vector<1x8xf32>
    %32 = arith.addf %28, %31 : vector<1x8xf32>
    %c0_26 = arith.constant 0 : index
    %c0_27 = arith.constant 0 : index
    %c0_28 = arith.constant 0 : index
    %33 = vector.load %arg8[%c0_26, %c0_27, %c0_28] : memref<1x1x8xf32, #tpu.memory_space<vmem>>, vector<1x1x8xf32>
    %34 = vector.shape_cast %33 : vector<1x1x8xf32> to vector<1x8xf32>
    %35 = vector.shape_cast %32 : vector<1x8xf32> to vector<1x1x8xf32>
    tpu.vector_store %arg8[%c0_26, %c0_27, %c0_28], %35 {strides = array<i32>} : memref<1x1x8xf32, #tpu.memory_space<vmem>>, vector<1x1x8xf32>,
    return
  }
  func.func @transform_0(%arg0: i32, %arg1: i32) -> (i32, i32) {
    %c2_i32 = arith.constant 2 : i32
    %0 = arith.muli %arg0, %c2_i32 : i32
    %1 = arith.addi %0, %arg1 : i32
    %c0_i32 = arith.constant 0 : i32
    %c0_i32_0 = arith.constant 0 : i32
    return %1, %c0_i32 : i32, i32
  }
  func.func @transform_1(%arg0: i32, %arg1: i32) -> (i32, i32) {
    %c0_i32 = arith.constant 0 : i32
    %c0_i32_0 = arith.constant 0 : i32
    %c0_i32_1 = arith.constant 0 : i32
    return %c0_i32, %c0_i32_0 : i32, i32
  }
  func.func @transform_2(%arg0: i32, %arg1: i32) -> (i32, i32) {
    %c0_i32 = arith.constant 0 : i32
    %c0_i32_0 = arith.constant 0 : i32
    %c0_i32_1 = arith.constant 0 : i32
    return %c0_i32, %c0_i32_0 : i32, i32
  }
  func.func @transform_3(%arg0: i32, %arg1: i32) -> (i32, i32) {
    %c2_i32 = arith.constant 2 : i32
    %0 = arith.muli %arg0, %c2_i32 : i32
    %1 = arith.addi %0, %arg1 : i32
    %c0_i32 = arith.constant 0 : i32
    %c0_i32_0 = arith.constant 0 : i32
    return %1, %c0_i32 : i32, i32
  }
  func.func @transform_4(%arg0: i32, %arg1: i32) -> (i32, i32, i32) {
    %c0_i32 = arith.constant 0 : i32
    %c0_i32_0 = arith.constant 0 : i32
    %c0_i32_1 = arith.constant 0 : i32
    return %arg0, %c0_i32, %c0_i32_0 : i32, i32, i32
  }
  func.func @transform_5(%arg0: i32, %arg1: i32) -> (i32, i32, i32) {
    %c0_i32 = arith.constant 0 : i32
    %c0_i32_0 = arith.constant 0 : i32
    %c0_i32_1 = arith.constant 0 : i32
    return %arg0, %c0_i32, %c0_i32_0 : i32, i32, i32
  }
  func.func @transform_6(%arg0: i32, %arg1: i32) -> (i32, i32, i32) {
    %c0_i32 = arith.constant 0 : i32
    %c0_i32_0 = arith.constant 0 : i32
    %c0_i32_1 = arith.constant 0 : i32
    return %arg0, %c0_i32, %c0_i32_0 : i32, i32, i32
  }
}

</mosaic_0001>

<bundles_post_ra>
// kernel: tpu_custom_call.1
= control target key start
LH: loop header
LB: loop body
LE: loop exit
PB: predicated region body
PF: predicated region fallthrough
CT: control target
= control target key end

     0   :  { %12 = vsyncpa [#allocation3], 0  ;;  %s1629_s0 = inlined_call_operand.vmem [shape: bf16[128,32], index: 0, kind: input, shape index: {}]   ;;  %s1630_s1 = inlined_call_operand.vmem [shape: bf16[32,128], index: 1, kind: input, shape index: {}]   ;;  %s1631_s2 = inlined_call_operand.vmem [shape: f32[1,128], index: 2, kind: input, shape index: {}]   ;;  %s1632_s3 = inlined_call_operand.vmem [shape: f32[128,8], index: 3, kind: input, shape index: {}]   ;;  %s1633_s4 = inlined_call_operand.hbm [shape: f32[2,128,128], index: 4, kind: output, shape index: {0}]   ;;  %s1634_s5 = inlined_call_operand.hbm [shape: f32[2,8,128], index: 5, kind: output, shape index: {1}]   ;;  %s1635_s6 = inlined_call_operand.hbm [shape: f32[2,1,8], index: 6, kind: output, shape index: {2}]  }
   0x1   :  { %14 = vsyncpa [#allocation3 + $0x1], 0 }
   0x2   :  { %15 = vsyncpa [#allocation5], 0 }
   0x3   :  { %17 = vsyncpa [#allocation5 + $0x1], 0  ;;  %s1318_s21 = smov 0   ;;  %s1320_s22 = smov 0  }
   0x4   :  { %s1322_s23 = smov 0   ;;  %s1324_s24 = smov 0  }
   0x5   :  { %s1326_s25 = smov 0   ;;  %s1328_s26 = smov 0  }
   0x6   :  { %s1330_s27 = smov 0   ;;  %s1332_s28 = smov 0  }
   0x7 LB: > { %1641 = sst [smem:[#allocation9_spill]] %s1265_s26  ;;  %s1637_s29 = sadd.s32 4294967295, %s1273_s28   ;;  %s1273_s28 = sphi %s1332_s28, %s23_s28   ;;  %s1269_s27 = sphi %s1330_s27, %s1654_s27   ;;  %s1265_s26 = sphi %s1328_s26, %s1653_s26   ;;  %s1261_s25 = sphi %s1326_s25, %s1652_s25   ;;  %s1257_s24 = sphi %s1324_s24, %s1651_s24   ;;  %s1253_s23 = sphi %s1322_s23, %s1657_s23   ;;  %s1249_s22 = sphi %s1320_s22, %s1656_s22   ;;  %s1245_s21 = sphi %s1318_s21, %s1655_s21  }
   0x8   : > { %1642 = sst [smem:[#allocation10_spill]] %s1269_s27  ;;  %s1636_s30 = sadd.s32 4294967294, %s1273_s28  }
   0x9   : > { %s32_s7 = sadd.s32 1, %s1265_s26  ;;  %s35_s8 = sadd.s32 1, %s1269_s27 }
   0xa   : > { %p33_p0 = scmp.ge.s32.totalorder %s32_s7, 2  ;;  %p154_p1 = scmp.ne.s32.totalorder %s1253_s23, %s1249_s22 }
   0xb   : > { %p155_p2 = scmp.eq.s32.totalorder %s1637_s29, 3  ;;  %p160_p4 = scmp.ne.s32.totalorder %s1249_s22, %s1245_s21 }
   0xc   : > { %s1659_s7 = smov (%p33_p0, %s32_s7), 0  ;;  %s1661_s8 = smov (!%p33_p0, %s35_s8), %s1269_s27 }
   0xd   : > { %1643 = sst [smem:[#allocation11_spill]] %s1659_s7  ;;  %p1369_p3 = por %p155_p2, %p154_p1 }
   0xe   : > { %p37_p5 = scmp.ge.s32.totalorder %s1661_s8, 2  ;;  %p161_p6 = scmp.eq.s32.totalorder %s1636_s30, 3 }
   0xf   : > { %p928_p7 = scmp.ge.s32.totalorder %s1273_s28, 1  ;;  %p263_p8 = scmp.lt.s32.totalorder %s1273_s28, 5 }
  0x10   : > { %s1663_s8 = smov (%p37_p5, %s1661_s8), 0  ;;  %p1381_p9 = por %p161_p6, %p160_p4 }
  0x11   : > { %1645 = sst [smem:[#allocation12_spill]] %s1663_s8  ;;  %p264_p10 = pnand %p928_p7, %p263_p8 }
  0x12   : > { %s141_s11 = ssub.s32 %s1269_s27, %s1663_s8  ;;  %s144_s12 = sadd.s32 1, %s1253_s23 }
  0x13   : > { %p142_p11 = scmp.eq.s32.totalorder %s141_s11, 0  ;;  %267 = sbr.rel (%p264_p10) target bundleno = 667 (0x29b), region = 36 }
  0x14   : > { %s1392_s14 = sand.u32 (!%p264_p10), 1, %s1249_s22   ;;  %s931_s15 = sshll.u32 (!%p264_p10), %s1261_s25, 1 }
  0x15   : > { %s1389_s13 = scalar_select %p142_p11, %s1253_s23, %s144_s12  }
  0x16   : > { %s929_s16 = sshll.u32 (!%p264_p10), %s1392_s14, 7  ;;  %s930_s17 = sshll.u32 (!%p264_p10), %s1392_s14, 3 }
  0x17   : > { %1647 = sst [smem:[#allocation13_spill]] %s1389_s13  ;;  %s312_s18 = sadd.s32 (!%p264_p10), %s1257_s24, %s931_s15 }
  0x18   : > { %s932_s19 = sshll.u32 (!%p264_p10), %s312_s18, 2  ;;  %s1408_s26 = scalar_lea.vmem (!%p264_p10), [#allocation2], %s929_s16 }
  0x19   : > { %p314_p12 = scmp.lt.s32.totalorder (!%p264_p10), %s932_s19, 15  ;;  %s1410_s13 = scalar_lea.vmem (!%p264_p10), [#allocation4], %s930_s17 }
  0x1a   : > { %s1413_s15 = scalar_lea.vmem [#allocation6], %s1392_s14  ;;  %p937_p13 = scmp.ne.s32.totalorder %s1257_s24, 0 }
  0x1b   : > { %s1665_s19 = smov (!%p314_p12, %s932_s19), 15  ;;  %vm353_vm0 = vcmask (!%p937_p13), 57344   ;;  %v1275_v0 = vmov (!%p937_p13), 0.0  }
  0x1c   : > { %s933_s20 = sshll.u32 %s1665_s19, 2  ;;  %s936_s11 = sshll.u32 %s1665_s19, 3  ;;  %336 = vst [vmem:[%s1408_s26] sm:$0xff] (!%p937_p13), %v1275_v0  ;;  %337 = vst [vmem:[%s1408_s26 + $0x8] sm:$0xff] (!%p937_p13), %v1275_v0 }
  0x1d   : > { %s1401_s29 = scalar_lea.vmem %s1629_s0, %s933_s20  ;;  %s1406_s27 = scalar_lea.vmem %s1632_s3, %s936_s11  ;;  %338 = vst [vmem:[%s1408_s26 + $0x10] sm:$0xff] (!%p937_p13), %v1275_v0  ;;  %339 = vst [vmem:[%s1408_s26 + $0x18] sm:$0xff] (!%p937_p13), %v1275_v0 }
  0x1e   : > { %335 = sbr.rel (%p937_p13) target bundleno = 37 (0x25), region = 40  ;;  %340 = vst [vmem:[%s1408_s26 + $0x20] sm:$0xff] (!%p937_p13), %v1275_v0  ;;  %341 = vst [vmem:[%s1408_s26 + $0x28] sm:$0xff] (!%p937_p13), %v1275_v0 }
  0x1f   : > { %342 = vst [vmem:[%s1408_s26 + $0x30] sm:$0xff] (!%p937_p13), %v1275_v0  ;;  %343 = vst [vmem:[%s1408_s26 + $0x38] sm:$0xff] (!%p937_p13), %v1275_v0 }
  0x20   : > { %344 = vst [vmem:[%s1408_s26 + $0x40] sm:$0xff] (!%p937_p13), %v1275_v0  ;;  %345 = vst [vmem:[%s1408_s26 + $0x48] sm:$0xff] (!%p937_p13), %v1275_v0 }
  0x21   : > { %346 = vst [vmem:[%s1408_s26 + $0x50] sm:$0xff] (!%p937_p13), %v1275_v0  ;;  %347 = vst [vmem:[%s1408_s26 + $0x58] sm:$0xff] (!%p937_p13), %v1275_v0 }
  0x22   : > { %348 = vst [vmem:[%s1408_s26 + $0x60] sm:$0xff] (!%p937_p13), %v1275_v0  ;;  %349 = vst [vmem:[%s1408_s26 + $0x68] sm:$0xff] (!%p937_p13), %v1275_v0 }
  0x23   : > { %350 = vst [vmem:[%s1408_s26 + $0x70] sm:$0xff] (!%p937_p13), %v1275_v0  ;;  %351 = vst [vmem:[%s1408_s26 + $0x78] sm:$0xff] (!%p937_p13), %v1275_v0 }
  0x24   : > { %352 = vst [vmem:[%s1410_s13] sm:$0xff] (!%p937_p13), %v1275_v0  ;;  %354 = vst.msk [vmem:[%s1413_s15] sm:$0x1] (!%p937_p13), %vm353_vm0, %v1275_v0 }
  0x25 PF: > { %v1107_v1 = vld [vmem:[%s1630_s1] sm:$0xff]   ;;  %vm392_vm1 = vcmask 261120   ;;  %v1108_v2 = vld [vmem:[%s1630_s1 + $0x8] sm:$0xff]   ;;  %vm712_vm2 = vcmask 64512   ;;  %v456_v7 = vld [vmem:[%s1406_s27 + $0x10] sm:$0xff]  ;;  %v1276_v37 = vmov 0.0  }
  0x26   : > { %980 = vmatprep.subr.bf16.mxu0 %v1107_v1  ;;  %v1109_v3 = vld [vmem:[%s1401_s29] sm:$0xff]   ;;  %v1110_v4 = vld [vmem:[%s1401_s29 + $0x8] sm:$0xff]   ;;  %v457_v11 = vld [vmem:[%s1406_s27 + $0x18] sm:$0xff]  ;;  %v710_v12 = vmul.f32 %v456_v7, %v456_v7  ;;  %vm1277_vm3 = vmmov 0   ;;  %vm727_vm4 = vcmask 57344   ;;  %s958_s18 = sshll.u32 %s1261_s25, 7 }
  0x27   : > { %981 = vmatpush3.bf16.msra.mxu0 %v1107_v1  ;;  %984 = vmatprep.mubr.msk.bf16.mxu0 %vm392_vm1, %v1109_v3  ;;  %v454_v5 = vld [vmem:[%s1406_s27] sm:$0xff]  ;;  %v455_v6 = vld [vmem:[%s1406_s27 + $0x8] sm:$0xff]  ;;  %v711_v13 = vmul.f32 %v457_v11, %v457_v11  ;;  %v645_v16 = vpack.c.bf16 %v457_v11, %v456_v7  ;;  %v460_v55 = vld [vmem:[%s1408_s26 + $0x10] sm:$0xff]  ;;  %s1648_s27 = sadd.s32 4294967295, %s1273_s28   ;;  %s768_s19 = sshll.u32 %s1410_s13, 4  ;;  %s1489_s19 = int_to_ptr.vmem [resolvable:$true] %s768_s19 }
  0x28   : > { %982 = vmatprep.subr.bf16.mxu0 %v1108_v2  ;;  %v644_v8 = vpack.c.bf16 %v455_v6, %v454_v5  ;;  %v708_v9 = vmul.f32 %v454_v5, %v454_v5  ;;  %v709_v10 = vmul.f32 %v455_v6, %v455_v6  ;;  %v716_v17 = vsel %vm712_vm2, %v710_v12, 0.0  ;;  %v938_v22 = vld [vmem:[%s1631_s2] ss:$0 sm:$0xff]  ;;  %v461_v58 = vld [vmem:[%s1408_s26 + $0x18] sm:$0xff]  ;;  %v459_v61 = vld [vmem:[%s1408_s26 + $0x8] sm:$0xff]  ;;  %s1472_s17 = sand.u32 1, %s1648_s27   ;;  %s1487_s30 = scalar_lea.hbm %s1634_s5, %s958_s18 }
  0x29   : > { %v718_v19 = vsel %vm712_vm2, %v711_v13, 0.0  ;;  %v458_v56 = vld [vmem:[%s1408_s26] sm:$0xff]  ;;  %v464_v3 = vld [vmem:[%s1408_s26 + $0x30] sm:$0xff]  ;;  %s959_s20 = sshll.u32 %s1261_s25, 4  ;;  %s781_s11 = sshll.u32 %s1413_s15, 4  ;;  %v465_v7 = vld [vmem:[%s1408_s26 + $0x38] sm:$0xff]  ;;  %s1496_s11 = int_to_ptr.vmem [resolvable:$true] %s781_s11 }
  0x2a   : > { %v713_v14 = vsel %vm712_vm2, %v708_v9, 0.0  ;;  %v714_v15 = vsel %vm712_vm2, %v709_v10, 0.0  ;;  %646 = vxpose.xlu1.c.b16.start [1/2] (short) (narrow) %v644_v8, 16  ;;  %v462_v5 = vld [vmem:[%s1408_s26 + $0x20] sm:$0xff]  ;;  %v463_v11 = vld [vmem:[%s1408_s26 + $0x28] sm:$0xff]  ;;  %s1494_s8 = scalar_lea.hbm %s1635_s6, %s959_s20  ;;  %s735_s29 = scalar_lea.sflag [#allocation5], %s1472_s17 }
  0x2b   : > { %983 = vmatpush3.bf16.msra.mxu0 %v1108_v2  ;;  %v715_v18 = vadd.f32 %v714_v15, %v713_v14  ;;  %v707_v53 = vld [vmem:[%s1413_s15] sm:$0x1]  ;;  %s1119_s16 = scalar_lea.vmem %s1489_s19, 128  ;;  %s1278_s27 = smov [#allocation4]  }
  0x2c   : > { %p1120_p0 = scmp.ne.s32.totalorder %s1489_s19, %s1119_s16  ;;  %s1123_s18 = sshll.u32 %s1278_s27, 4  ;;  %s1124_s18 = int_to_ptr.vmem [resolvable:$false] %s1123_s18 }
  0x2d   : > { %v717_v20 = vadd.f32 %v716_v17, %v715_v18  ;;  %s1125_s20 = scalar_lea.vmem %s1124_s18, 256  ;;  %p1126_p4 = scmp.lt.s32.totalorder %s1489_s19, %s1124_s18 }
  0x2e   : > { %985 = vmatmul.mubr.msk.bf16.vlgmr.msra.gmra.mrb[0].mxu0 %vm392_vm1, %v1110_v4  ;;  %647 = vxpose.xlu1.c.b16.end [2/2] (short) (narrow) %v645_v16, 16  ;;  %v643_v4 = vld [vmem:[%s1410_s13] sm:$0xff]  ;;  %p1121_p1 = pnand %p1120_p0, %p1369_p3  ;;  %p1127_p5 = scmp.lt.s32.totalorder %s1125_s20, %s1119_s16 }
  0x2f   : > { %v719_v21 = vadd.f32 %v718_v19, %v717_v20 }
  0x30   : > { %p1122_p2 = pneg %p1121_p1  ;;  %p1128_p6 = por %p1127_p5, %p1126_p4 }
  0x31   : > { %v720_v47 = vrot.slane %v719_v21, 4 }
  0x32   : > { %p1129_p7 = pnand %p1128_p6, %p1122_p2 }
  0x33   : > { %v721_v48 = vadd.f32 %v720_v47, %v719_v21 }
  0x35   : > { %v722_v49 = vrot.slane %v721_v48, 2 }
  0x37   : > { %v723_v50 = vadd.f32 %v722_v49, %v721_v48 }
  0x39   : > { %v724_v51 = vrot.slane %v723_v50, 1 }
  0x3b   : > { %v725_v52 = vadd.f32 %v724_v51, %v723_v50 }
  0x3d   : > { %v726_v54 = vadd.f32 %v725_v52, %v707_v53 }
  0x3f   : > { %728 = vst.msk [vmem:[%s1413_s15] sm:$0x1] %vm727_vm4, %v726_v54 }
  0x90   : > { %v654_v41 = vpop.trf.xlu1 }
 0x101   : > { %v986_v23 = vpop.f32.mrb[0].mxu0 }
 0x102   : > { %v442_v24 = vadd.f32 %v986_v23, %v938_v22  ;;  %v433_v25 = vpop.f32.mrb[1].mxu0 }
 0x103   : > { %v434_v26 = vadd.f32 %v938_v22, %v433_v25  ;;  %v987_v27 = vpop.f32.mrb[2].mxu0 }
 0x104   : > { %1111 = vtanh.f32 %v442_v24  ;;  %v445_v28 = vadd.f32 %v987_v27, %v938_v22  ;;  %v436_v29 = vpop.f32.mrb[3].mxu0 }
 0x105   : > { %1113 = vtanh.f32 %v434_v26  ;;  %v437_v30 = vadd.f32 %v938_v22, %v436_v29 }
 0x106   : > { %1115 = vtanh.f32 %v445_v28 }
 0x107   : > { %1117 = vtanh.f32 %v437_v30 }
 0x10e   : > { %v1112_v31 = vpop.eup %1111 }
 0x10f   : > { %v1114_v32 = vpop.eup %1113 }
 0x110   : > { %v1116_v33 = vpop.eup %1115 }
 0x111   : > { %v1118_v34 = vpop.eup %1117  ;;  %v453_v35 = vpack.c.bf16 %v1116_v33, %v1112_v31 }
 0x112   : > { %v452_v36 = vpack.c.bf16 %v1118_v34, %v1114_v32 }
 0x114   : > { %474 = vxpose.xlu0.c.b16.start [1/2] (short) %v452_v36, 128  ;;  %988 = vmatprep.subr.bf16.mxu0 %v452_v36 }
 0x115   : > { %1016 = vmatprep.subr.bf16.mxu1 %v452_v36  ;;  %989 = vmatpush3.bf16.msra.mxu0 %v452_v36 }
 0x116   : > { %1018 = vmatpush3.bf16.msra.mxu1 %v452_v36  ;;  %990 = vmatprep.subr.bf16.mxu0 %v453_v35 }
 0x117   : > { %1017 = vmatprep.subr.bf16.mxu1 %v453_v35 }
 0x118   : > { %475 = vxpose.xlu0.c.b16.end [2/2] (short) %v453_v35, 128 }
 0x119   : > { %991 = vmatpush3.bf16.msra.mxu0 %v453_v35 }
 0x11a   : > { %1019 = vmatpush3.bf16.msra.mxu1 %v453_v35  ;;  %1008 = vmatprep.subr.bf16.mxu0 %v1276_v37 }
 0x17a   : > { %v482_v38 = vpop.trf.xlu0 }
 0x17b   : > { %992 = vmatprep.mubr.msk.bf16.mxu0 %vm392_vm1, %v482_v38 }
 0x17e   : > { %v483_v39 = vpop.trf.xlu0 }
 0x17f   : > { %993 = vmatmul.mubr.msk.bf16.vlgmr.msra.gmra.mrb[4].mxu0 %vm392_vm1, %v483_v39 }
 0x180   : > { %1009 = vmatpush3.bf16.msra.mxu0 %v452_v36  ;;  %1012 = vmatprep.mubr.msk.bf16.mxu0 %vm1277_vm3, %v1276_v37 }
 0x181   : > { %1010 = vmatprep.subr.bf16.mxu0 %v1276_v37 }
 0x182   : > { %v484_v40 = vpop.trf.xlu0 }
 0x183   : > { %996 = vmatprep.mubr.msk.bf16.mxu1 %vm392_vm1, %v484_v40 }
 0x184   : > { %1011 = vmatpush3.bf16.msra.mxu0 %v453_v35 }
 0x186   : > { %v485_v42 = vpop.trf.xlu0 }
 0x187   : > { %997 = vmatmul.mubr.msk.bf16.vlgmr.msra.gmra.mrb[0].mxu1 %vm392_vm1, %v485_v42  ;;  %1013 = vmatmul.mubr.msk.bf16.vlgmr.msra.gmra.mrb[8].mxu0 %vm392_vm1, %v654_v41 }
 0x18a   : > { %v486_v43 = vpop.trf.xlu0 }
 0x18b   : > { %1000 = vmatprep.mubr.msk.bf16.mxu1 %vm392_vm1, %v486_v43 }
 0x18e   : > { %v487_v44 = vpop.trf.xlu0 }
 0x18f   : > { %1001 = vmatmul.mubr.msk.bf16.gmra.mrb[4].mxu1 %vm392_vm1, %v487_v44 }
 0x192   : > { %v488_v45 = vpop.trf.xlu0 }
 0x193   : > { %1004 = vmatprep.mubr.msk.bf16.mxu1 %vm392_vm1, %v488_v45 }
 0x196   : > { %v489_v46 = vpop.trf.xlu0 }
 0x197   : > { %1005 = vmatmul.mubr.msk.bf16.gmra.mrb[8].mxu1 %vm392_vm1, %v489_v46 }
 0x252   : > { %v994_v57 = vpop.f32.mrb[4].mxu0 }
 0x253   : > { %v613_v59 = vadd.f32 %v994_v57, %v460_v55  ;;  %v548_v60 = vpop.f32.mrb[5].mxu0 }
 0x254   : > { %v611_v62 = vadd.f32 %v548_v60, %v458_v56  ;;  %v995_v63 = vpop.f32.mrb[6].mxu0 }
 0x255   : > { %629 = vst [vmem:[%s1408_s26 + $0x10] sm:$0xff] %v613_v59  ;;  %v614_v0 = vadd.f32 %v995_v63, %v461_v58  ;;  %v551_v1 = vpop.f32.mrb[7].mxu0 }
 0x256   : > { %627 = vst [vmem:[%s1408_s26] sm:$0xff] %v611_v62  ;;  %v612_v2 = vadd.f32 %v551_v1, %v459_v61 }
 0x257   : > { %630 = vst [vmem:[%s1408_s26 + $0x18] sm:$0xff] %v614_v0 }
 0x258   : > { %628 = vst [vmem:[%s1408_s26 + $0x8] sm:$0xff] %v612_v2 }
 0x25a   : > { %v998_v6 = vpop.f32.mrb[0].mxu1  ;;  %v699_v8 = vpop.f32.mrb[8].mxu0 }
 0x25b   : > { %v617_v9 = vadd.f32 %v998_v6, %v464_v3  ;;  %v564_v10 = vpop.f32.mrb[1].mxu1  ;;  %v705_v12 = vadd.f32 %v699_v8, %v643_v4  ;;  %v1014_v13 = vpop.f32.mrb[9].mxu0 }
 0x25c   : > { %v615_v14 = vadd.f32 %v564_v10, %v462_v5  ;;  %v999_v15 = vpop.f32.mrb[2].mxu1  ;;  %v702_v16 = vpop.f32.mrb[10].mxu0 }
 0x25d   : > { %633 = vst [vmem:[%s1408_s26 + $0x30] sm:$0xff] %v617_v9  ;;  %v618_v17 = vadd.f32 %v999_v15, %v465_v7  ;;  %v567_v18 = vpop.f32.mrb[3].mxu1  ;;  %706 = vst [vmem:[%s1410_s13] sm:$0xff] %v705_v12  ;;  %v1015_v19 = vpop.f32.mrb[11].mxu0 }
 0x25e   : > { %631 = vst [vmem:[%s1408_s26 + $0x20] sm:$0xff] %v615_v14  ;;  %v616_v20 = vadd.f32 %v567_v18, %v463_v11 }
 0x25f   : > { %1132 = shalt.err (!%p1129_p7)
}
 0x260   : > { %s1133_s13 = scalar_lea.hbm %s1487_s30, 128  ;;  %s1137_s15 = scalar_lea.hbm %s1634_s5, 256 }
 0x261   : > { %p1134_p8 = scmp.ne.s32.totalorder %s1487_s30, %s1133_s13  ;;  %p1138_p12 = scmp.lt.u32.totalorder %s1487_s30, %s1634_s5 }
 0x262   : > { %p1139_p13 = scmp.lt.u32.totalorder %s1137_s15, %s1133_s13  ;;  %p1141_p1 = scmp.lt.u32.totalorder %s1133_s13, %s1487_s30 }
 0x263   : > { %p1135_p10 = pnand %p1134_p8, %p1369_p3 }
 0x264   : > { %p1140_p0 = por %p1139_p13, %p1138_p12 }
 0x265   : > { %p1136_p11 = pneg %p1135_p10 }
 0x266   : > { %p1142_p2 = por %p1141_p1, %p1140_p0 }
 0x268   : > { %p1143_p4 = pnand %p1142_p2, %p1136_p11 }
 0x26a   : > { %1146 = shalt.err (!%p1143_p4)
}
 0x26b   : > { %1021 = dma.vmem_to_hbm [thread:$0]  (%p1369_p3), %s1489_s19, 128, %s1487_s30, %s735_s29   ;;  %634 = vst [vmem:[%s1408_s26 + $0x38] sm:$0xff] %v618_v17 }
 0x26c   : > { %s1147_s16 = scalar_lea.vmem %s1496_s11, 16  ;;  %s1279_s18 = smov [#allocation6]  }
 0x26d   : > { %p1148_p5 = scmp.ne.s32.totalorder %s1496_s11, %s1147_s16  ;;  %s1151_s20 = sshll.u32 %s1279_s18, 4  ;;  %s1152_s20 = int_to_ptr.vmem [resolvable:$false] %s1151_s20 }
 0x26e   : > { %s1153_s13 = scalar_lea.vmem %s1152_s20, 32  ;;  %p1154_p8 = scmp.lt.s32.totalorder %s1496_s11, %s1152_s20 }
 0x26f   : > { %p1149_p6 = pnand %p1148_p5, %p1369_p3  ;;  %p1155_p10 = scmp.lt.s32.totalorder %s1153_s13, %s1147_s16 }
 0x271   : > { %p1150_p7 = pneg %p1149_p6  ;;  %p1156_p11 = por %p1155_p10, %p1154_p8 }
 0x273   : > { %p1157_p12 = pnand %p1156_p11, %p1150_p7 }
 0x275   : > { %1160 = shalt.err (!%p1157_p12)
}
 0x276   : > { %s1161_s19 = scalar_lea.hbm %s1494_s8, 16  ;;  %s1165_s24 = scalar_lea.hbm %s1635_s6, 32 }
 0x277   : > { %p1162_p13 = scmp.ne.s32.totalorder %s1494_s8, %s1161_s19  ;;  %p1166_p2 = scmp.lt.u32.totalorder %s1494_s8, %s1635_s6 }
 0x278   : > { %p1167_p4 = scmp.lt.u32.totalorder %s1165_s24, %s1161_s19  ;;  %p1169_p6 = scmp.lt.u32.totalorder %s1161_s19, %s1494_s8 }
 0x279   : > { %p1163_p0 = pnand %p1162_p13, %p1369_p3 }
 0x27a   : > { %p1168_p5 = por %p1167_p4, %p1166_p2 }
 0x27b   : > { %p1164_p1 = pneg %p1163_p0 }
 0x27c   : > { %p1170_p7 = por %p1169_p6, %p1168_p5 }
 0x27e   : > { %p1171_p8 = pnand %p1170_p7, %p1164_p1 }
 0x280   : > { %1174 = shalt.err (!%p1171_p8)
}
 0x281   : > { %1022 = dma.vmem_to_hbm [thread:$0]  (%p1369_p3), %s1496_s11, 16, %s1494_s8, %s735_s29   ;;  %632 = vst [vmem:[%s1408_s26 + $0x28] sm:$0xff] %v616_v20  ;;  %v468_v21 = vld [vmem:[%s1408_s26 + $0x50] sm:$0xff]  ;;  %v466_v22 = vld [vmem:[%s1408_s26 + $0x40] sm:$0xff]  ;;  %v1002_v23 = vpop.f32.mrb[4].mxu1  ;;  %v469_v24 = vld [vmem:[%s1408_s26 + $0x58] sm:$0xff] }
 0x282   : > { %v621_v25 = vadd.f32 %v1002_v23, %v468_v21  ;;  %v580_v26 = vpop.f32.mrb[5].mxu1  ;;  %v467_v27 = vld [vmem:[%s1408_s26 + $0x48] sm:$0xff]  ;;  %v472_v33 = vld [vmem:[%s1408_s26 + $0x70] sm:$0xff]  ;;  %v470_v34 = vld [vmem:[%s1408_s26 + $0x60] sm:$0xff]  ;;  %s962_s17 = sshll.u32 %s1261_s25, 11  ;;  %s752_s11 = sshll.u32 %s1408_s26, 4  ;;  %s1570_s11 = int_to_ptr.vmem [resolvable:$true] %s752_s11 }
 0x283   : > { %v619_v28 = vadd.f32 %v580_v26, %v466_v22  ;;  %v1003_v29 = vpop.f32.mrb[6].mxu1  ;;  %v473_v36 = vld [vmem:[%s1408_s26 + $0x78] sm:$0xff]  ;;  %v471_v39 = vld [vmem:[%s1408_s26 + $0x68] sm:$0xff]  ;;  %s1568_s27 = scalar_lea.hbm %s1633_s4, %s962_s17  ;;  %s730_s25 = scalar_lea.sflag [#allocation3], %s1392_s14 }
 0x284   : > { %637 = vst [vmem:[%s1408_s26 + $0x50] sm:$0xff] %v621_v25  ;;  %v622_v30 = vadd.f32 %v1003_v29, %v469_v24  ;;  %v583_v31 = vpop.f32.mrb[7].mxu1  ;;  %s1175_s16 = scalar_lea.vmem %s1570_s11, 2048  ;;  %s1280_s18 = smov [#allocation2]  }
 0x285   : > { %635 = vst [vmem:[%s1408_s26 + $0x40] sm:$0xff] %v619_v28  ;;  %v620_v32 = vadd.f32 %v583_v31, %v467_v27  ;;  %v1006_v35 = vpop.f32.mrb[8].mxu1  ;;  %p1176_p10 = scmp.ne.s32.totalorder %s1570_s11, %s1175_s16  ;;  %s1179_s20 = sshll.u32 %s1280_s18, 4  ;;  %s1180_s20 = int_to_ptr.vmem [resolvable:$false] %s1179_s20 }
 0x286   : > { %638 = vst [vmem:[%s1408_s26 + $0x58] sm:$0xff] %v622_v30  ;;  %v625_v37 = vadd.f32 %v1006_v35, %v472_v33  ;;  %v596_v38 = vpop.f32.mrb[9].mxu1  ;;  %s1181_s13 = scalar_lea.vmem %s1180_s20, 4096  ;;  %p1182_p13 = scmp.lt.s32.totalorder %s1570_s11, %s1180_s20 }
 0x287   : > { %636 = vst [vmem:[%s1408_s26 + $0x48] sm:$0xff] %v620_v32  ;;  %v623_v40 = vadd.f32 %v596_v38, %v470_v34  ;;  %v1007_v41 = vpop.f32.mrb[10].mxu1  ;;  %p1177_p11 = pnand %p1176_p10, %p1369_p3  ;;  %p1183_p0 = scmp.lt.s32.totalorder %s1181_s13, %s1175_s16 }
 0x288   : > { %641 = vst [vmem:[%s1408_s26 + $0x70] sm:$0xff] %v625_v37  ;;  %v626_v42 = vadd.f32 %v1007_v41, %v473_v36  ;;  %v599_v43 = vpop.f32.mrb[11].mxu1 }
 0x289   : > { %639 = vst [vmem:[%s1408_s26 + $0x60] sm:$0xff] %v623_v40  ;;  %v624_v44 = vadd.f32 %v599_v43, %v471_v39  ;;  %p1178_p12 = pneg %p1177_p11  ;;  %p1184_p1 = por %p1183_p0, %p1182_p13 }
 0x28a   : > { %642 = vst [vmem:[%s1408_s26 + $0x78] sm:$0xff] %v626_v42 }
 0x28b   : > { %640 = vst [vmem:[%s1408_s26 + $0x68] sm:$0xff] %v624_v44  ;;  %p1185_p2 = pnand %p1184_p1, %p1178_p12 }
 0x28d   : > { %1188 = shalt.err (!%p1185_p2)
}
 0x28e   : > { %s1189_s26 = scalar_lea.hbm %s1568_s27, 2048  ;;  %s1193_s12 = scalar_lea.hbm %s1633_s4, 4096 }
 0x28f   : > { %p1190_p4 = scmp.ne.s32.totalorder %s1568_s27, %s1189_s26  ;;  %p1194_p7 = scmp.lt.u32.totalorder %s1568_s27, %s1633_s4 }
 0x290   : > { %p1195_p8 = scmp.lt.u32.totalorder %s1193_s12, %s1189_s26  ;;  %p1197_p11 = scmp.lt.u32.totalorder %s1189_s26, %s1568_s27 }
 0x291   : > { %p1191_p5 = pnand %p1190_p4, %p1369_p3 }
 0x292   : > { %p1196_p10 = por %p1195_p8, %p1194_p7 }
 0x293   : > { %p1192_p6 = pneg %p1191_p5 }
 0x294   : > { %p1198_p12 = por %p1197_p11, %p1196_p10 }
 0x296   : > { %p1199_p13 = pnand %p1198_p12, %p1192_p6 }
 0x298   : > { %1202 = shalt.err (!%p1199_p13)
}
 0x299   : > { %s1281_s7 = smov 128   ;;  %s1282_s17 = smov 8  }
 0x29a   : > { %1020 = dma.vmem_to_hbm [thread:$0]  (%p1369_p3), %s1570_s11, 2048, %s1568_s27, %s730_s25, %s1281_s7, %s1281_s7, %s1282_s17  }
 0x29b PF: > { %p1036_p0 = scmp.ge.s32.totalorder %s1273_s28, 2  ;;  %s793_s8 = sand.u32 1, %s1245_s21  }
 0x29c   : > { %s794_s29 = scalar_lea.sflag [#allocation3], %s793_s8 }
 0x29d   : > { %p1027_p1 = pnand %p1036_p0, %p1381_p9 }
 0x29f   : > { %1236 = dma.done.wait (!%p1027_p1), %s794_s29, 2048  }
 0x2a0   : > { %1238 = vsyncadd (!%p1027_p1), %s794_s29, 4294965248  ;;  %s1649_s16 = sadd.s32 4294967294, %s1273_s28  }
 0x2a1   : > { %s802_s18 = sand.u32 1, %s1649_s16  }
 0x2a2   : > { %s803_s20 = scalar_lea.sflag [#allocation5], %s802_s18 }
 0x2a3   : > { %1240 = dma.done.wait (!%p1027_p1), %s803_s20, 144  }
 0x2a4   : > { %1242 = vsyncadd (!%p1027_p1), %s803_s20, 4294967152  ;;  %s23_s28 = sadd.s32 1, %s1273_s28   ;;  %s1650_s9 = sld [smem:[#allocation13_spill]] }
 0x2a5   : > { %p20_p3 = scmp.ge.s32.totalorder %s23_s28, 6   ;;  %s1651_s24 = sld [smem:[#allocation9_spill]] }
 0x2a6   : > { %s1652_s25 = sld [smem:[#allocation10_spill]]  ;;  %s1653_s26 = sld [smem:[#allocation11_spill]] }
 0x2a7   : > { %s1654_s27 = sld [smem:[#allocation12_spill]]  ;;  %s1655_s21 = smov %s1249_s22 }
 0x2a8   : > { %s1656_s22 = smov %s1253_s23  ;;  %22 = sbr.rel (!%p20_p3) target bundleno = 7 (0x7), region = 110 }
 0x2aa   : > { %s1657_s23 = smov %s1650_s9 }
 0x2af   :  { %816 = vsyncpa [#allocation3], 1 }
 0x2b0   :  { %818 = vsyncpa [#allocation3 + $0x1], 1 }
 0x2b1   :  { %819 = vsyncpa [#allocation5], 1 }
 0x2b2   :  { %821 = vsyncpa [#allocation5 + $0x1], 1 }

</bundles_post_ra>
